<compile_context>
chip_gen: v5e
topology: v5e:2x2
jax: 0.10.0
libtpu: 0.0.40
codegen_flags: <defaults>
</compile_context>

<pallas_src>
import functools

import jax
import jax.numpy as jnp
from jax import lax
from jax.experimental import pallas as pl
from jax.experimental.pallas import tpu as pltpu

LANES = 128
_VMEM_BUDGET = 40 << 20   # total scoped-VMEM target (clears v7x 64 MiB physical VMEM/TC)
_VMEM_SLACK = 8 << 20     # headroom for Mosaic internal scratch


def _cdiv(a, b):
    return -(-a // b)


def _round_up(x, m):
    return _cdiv(x, m) * m


def _kl_f32(m1_ref, lv1_ref, m2_ref, lv2_ref):
    m1 = m1_ref[...].astype(jnp.float32)
    lv1 = lv1_ref[...].astype(jnp.float32)
    m2 = m2_ref[...].astype(jnp.float32)
    lv2 = lv2_ref[...].astype(jnp.float32)
    diff = m1 - m2
    return 0.5 * (-1.0 + lv2 - lv1 + jnp.exp(lv1 - lv2) + diff * diff * jnp.exp(-lv2))


def _kl_elementwise_kernel(m1_ref, lv1_ref, m2_ref, lv2_ref, o_ref):
    # A ragged last block reads garbage rows beyond the array end; exp() on garbage is
    # harmless on TPU (no FP traps) and Pallas discards the out-of-bounds output rows.
    o_ref[...] = _kl_f32(m1_ref, lv1_ref, m2_ref, lv2_ref).astype(o_ref.dtype)


def _kl_partial_sum_kernel(m1_ref, lv1_ref, m2_ref, lv2_ref, o_ref, *,
                           rows, block_rows, blocks_per_chunk, need_mask):
    b = pl.program_id(1)

    @pl.when(b == 0)
    def _():
        o_ref[...] = jnp.zeros_like(o_ref)

    kl = _kl_f32(m1_ref, lv1_ref, m2_ref, lv2_ref)          # (block_rows, LANES) f32

    if need_mask:
        # Only out-of-bounds *rows* of the ragged last block can poison the sum
        # (lane padding is zero-filled and KL(0,0,0,0) == 0 exactly).  Row-index-only
        # mask: no int32 overflow even for > 2**31 total elements.
        blk = pl.program_id(0) * blocks_per_chunk + b
        rid = lax.broadcasted_iota(jnp.int32, kl.shape, 0)
        kl = jnp.where(blk * block_rows + rid < rows, kl, 0.0)

    if block_rows % 8 == 0:
        # Vreg-aligned (8, 128) partial sums: pure VPU adds, no cross-lane work.
        # The single cross-lane reduction happens once, in the wrapper, on the tiny
        # (8 * n_chunks, 128) partial-sum output.
        o_ref[...] += kl.reshape(-1, 8, LANES).sum(axis=0)
    else:
        # Tiny single-block case (rows < 2 * sublane multiple): (1, 128) accumulator.
        o_ref[...] += jnp.sum(kl, axis=0, keepdims=True)


def _choose_block_rows(rows, itemsize):
    """Largest block that keeps 4 inputs + 1 output (double-buffered, native dtype)
    plus ~6 full-block f32 temporaries under the VMEM budget, while giving the grid
    at least 2 (ideally an even number of) blocks so both TensorCores on megacore
    parts have work."""
    sub_mult = max(8, 32 // max(itemsize, 1))            # f32: 8, bf16: 16, int8/fp8: 32
    bytes_per_row = 10 * LANES * itemsize + 6 * LANES * 4
    max_block_rows = (_VMEM_BUDGET - _VMEM_SLACK) // bytes_per_row   # f32 -> 4096 rows
    max_block_rows = max(sub_mult, (max_block_rows // sub_mult) * sub_mult)
    if rows < 2 * sub_mult:
        return rows                                      # single (possibly ragged) block
    if rows <= max_block_rows:
        n_blocks = 2                                     # split even small inputs across 2 TCs
    else:
        n_blocks = _cdiv(rows, max_block_rows)
        n_blocks += n_blocks & 1                         # even block count for load balance
    return min(max_block_rows, _round_up(_cdiv(rows, n_blocks), sub_mult))


def gaussian_kl_div_loss(mean1, logvar1, mean2, logvar2, reduce=False):
    """Matches GaussianKLDivLoss.forward semantics (reduce=False by default)."""
    orig_shape = mean1.shape
    orig_dtype = mean1.dtype
    n = mean1.size

    if n == 0:
        kl = jnp.zeros(orig_shape, orig_dtype)
        return kl.mean() if reduce else kl

    itemsize = jnp.dtype(orig_dtype).itemsize
    n_lane_pad = (-n) % LANES
    rows = (n + n_lane_pad) // LANES

    def prep(x):
        x = x.reshape(-1)                       # contiguous reshape: metadata only
        if n_lane_pad:
            x = jnp.pad(x, (0, n_lane_pad))     # <=127 zeros; KL of zeros == 0
        return x.reshape(rows, LANES)

    a, b, c, d = (prep(t) for t in (mean1, logvar1, mean2, logvar2))

    block_rows = _choose_block_rows(rows, itemsize)
    num_blocks = _cdiv(rows, block_rows)

    block_bytes = block_rows * LANES * itemsize
    vmem_limit = int(min(_VMEM_BUDGET,
                         max(32 << 20,
                             10 * block_bytes + 6 * block_rows * LANES * 4 + _VMEM_SLACK)))

    if not reduce:
        spec = pl.BlockSpec((block_rows, LANES), lambda i: (i, 0))
        out = pl.pallas_call(
            _kl_elementwise_kernel,
            out_shape=jax.ShapeDtypeStruct((rows, LANES), orig_dtype),
            grid=(num_blocks,),
            in_specs=[spec, spec, spec, spec],
            out_specs=spec,
            compiler_params=pltpu.CompilerParams(
                dimension_semantics=("parallel",),
                vmem_limit_bytes=vmem_limit),
        )(a, b, c, d)
        kl = out.reshape(-1)
        if n_lane_pad:
            kl = kl[:n]
        return kl.reshape(orig_shape)

    # reduce=True: 2-D grid (chunks="parallel", blocks-per-chunk="arbitrary") so the
    # reduction is sharded across TensorCores on megacore parts (v7x).  Each chunk
    # owns one vector-shaped partial-sum block, revisited across the arbitrary axis.
    n_chunks = 2 if (num_blocks % 2 == 0 and num_blocks >= 2) else 1
    bpc = num_blocks // n_chunks
    acc_rows = 8 if block_rows % 8 == 0 else 1

    kernel = functools.partial(
        _kl_partial_sum_kernel, rows=rows, block_rows=block_rows,
        blocks_per_chunk=bpc, need_mask=(rows % block_rows != 0))

    in_spec = pl.BlockSpec((block_rows, LANES), lambda ci, bi: (ci * bpc + bi, 0))
    out_spec = pl.BlockSpec((acc_rows, LANES), lambda ci, bi: (ci, 0))

    partial = pl.pallas_call(
        kernel,
        out_shape=jax.ShapeDtypeStruct((acc_rows * n_chunks, LANES), jnp.float32),
        grid=(n_chunks, bpc),
        in_specs=[in_spec, in_spec, in_spec, in_spec],
        out_specs=out_spec,
        compiler_params=pltpu.CompilerParams(
            dimension_semantics=("parallel", "arbitrary"),
            vmem_limit_bytes=vmem_limit),
    )(a, b, c, d)

    # Single cross-lane reduction on the tiny partial-sum output, then normalize.
    return (jnp.sum(partial) / jnp.float32(n)).astype(orig_dtype)


def _ref_kl(mean1, logvar1, mean2, logvar2):
    return 0.5 * (-1.0 + logvar2 - logvar1 + jnp.exp(logvar1 - logvar2)
                  + (mean1 - mean2) ** 2 * jnp.exp(-logvar2))


if __name__ == "__main__":
    key = jax.random.PRNGKey(0)
    k1, k2, k3, k4 = jax.random.split(key, 4)

    kl_fn = jax.jit(gaussian_kl_div_loss, static_argnames=("reduce",))

    def check(shape):
        m1 = jax.random.normal(k1, shape, dtype=jnp.float32)
        lv1 = jax.random.normal(k2, shape, dtype=jnp.float32) * 0.1
        m2 = jax.random.normal(k3, shape, dtype=jnp.float32)
        lv2 = jax.random.normal(k4, shape, dtype=jnp.float32) * 0.1
        ref = _ref_kl(m1, lv1, m2, lv2)

        kl = jax.block_until_ready(kl_fn(m1, lv1, m2, lv2, reduce=False))
        assert kl.shape == shape
        assert jnp.allclose(kl, ref, atol=1e-5, rtol=1e-5)

        kl_mean = jax.block_until_ready(kl_fn(m1, lv1, m2, lv2, reduce=True))
        assert kl_mean.shape == ()
        assert jnp.allclose(kl_mean, ref.mean(), atol=1e-6, rtol=1e-4)

    check((2, 4, 16, 16))   # aligned: n % 128 == 0, copy-free, 2 blocks / 2 chunks
    check((3, 5, 7))        # tiny + lane padding: single ragged block, (1,128) accumulator
    check((3, 17, 129))     # lane pad + ragged last row-block: row mask + 2 parallel chunks
    print("KERNEL_OK")
</pallas_src>

<mosaic_0001>
module attributes {stable_mosaic.version = 11 : i64} {
  func.func @_kl_elementwise_kernel(%arg0: i32, %arg1: memref<8x128xf32, #tpu.memory_space<vmem>>, %arg2: memref<8x128xf32, #tpu.memory_space<vmem>>, %arg3: memref<8x128xf32, #tpu.memory_space<vmem>>, %arg4: memref<8x128xf32, #tpu.memory_space<vmem>>, %arg5: memref<8x128xf32, #tpu.memory_space<vmem>>) attributes {dimension_semantics = [#tpu.dimension_semantics<parallel>], iteration_bounds = array<i64: 2>, scalar_prefetch = 0 : i64, scratch_operands = 0 : i64, tpu.core_type = #tpu.core_type<tc>, window_params = [{transform_indices = @transform_0, window_bounds = array<i64: 8, 128>}, {transform_indices = @transform_1, window_bounds = array<i64: 8, 128>}, {transform_indices = @transform_2, window_bounds = array<i64: 8, 128>}, {transform_indices = @transform_3, window_bounds = array<i64: 8, 128>}, {transform_indices = @transform_4, window_bounds = array<i64: 8, 128>}]} {
    %c0 = arith.constant 0 : index
    %c0_0 = arith.constant 0 : index
    %0 = vector.load %arg1[%c0, %c0_0] : memref<8x128xf32, #tpu.memory_space<vmem>>, vector<8x128xf32>
    %c0_1 = arith.constant 0 : index
    %c0_2 = arith.constant 0 : index
    %1 = vector.load %arg2[%c0_1, %c0_2] : memref<8x128xf32, #tpu.memory_space<vmem>>, vector<8x128xf32>
    %c0_3 = arith.constant 0 : index
    %c0_4 = arith.constant 0 : index
    %2 = vector.load %arg3[%c0_3, %c0_4] : memref<8x128xf32, #tpu.memory_space<vmem>>, vector<8x128xf32>
    %c0_5 = arith.constant 0 : index
    %c0_6 = arith.constant 0 : index
    %3 = vector.load %arg4[%c0_5, %c0_6] : memref<8x128xf32, #tpu.memory_space<vmem>>, vector<8x128xf32>
    %4 = arith.subf %0, %2 : vector<8x128xf32>
    %cst = arith.constant -1.000000e+00 : f32
    %5 = vector.broadcast %cst : f32 to vector<8x128xf32>
    %6 = arith.addf %5, %3 : vector<8x128xf32>
    %7 = arith.subf %6, %1 : vector<8x128xf32>
    %8 = arith.subf %1, %3 : vector<8x128xf32>
    %9 = math.exp %8 : vector<8x128xf32>
    %10 = arith.addf %7, %9 : vector<8x128xf32>
    %11 = arith.mulf %4, %4 : vector<8x128xf32>
    %cst_7 = arith.constant 0.000000e+00 : f32
    %12 = vector.broadcast %cst_7 : f32 to vector<8x128xf32>
    %13 = arith.subf %12, %3 : vector<8x128xf32>
    %14 = math.exp %13 : vector<8x128xf32>
    %15 = arith.mulf %11, %14 : vector<8x128xf32>
    %16 = arith.addf %10, %15 : vector<8x128xf32>
    %cst_8 = arith.constant 5.000000e-01 : f32
    %17 = vector.broadcast %cst_8 : f32 to vector<8x128xf32>
    %18 = arith.mulf %17, %16 : vector<8x128xf32>
    %c0_9 = arith.constant 0 : index
    %c0_10 = arith.constant 0 : index
    %19 = vector.load %arg5[%c0_9, %c0_10] : memref<8x128xf32, #tpu.memory_space<vmem>>, vector<8x128xf32>
    tpu.vector_store %arg5[%c0_9, %c0_10], %18 {strides = array<i32>} : memref<8x128xf32, #tpu.memory_space<vmem>>, vector<8x128xf32>,
    return
  }
  func.func @transform_0(%arg0: i32) -> (i32, i32) {
    %c0_i32 = arith.constant 0 : i32
    %c0_i32_0 = arith.constant 0 : i32
    return %arg0, %c0_i32 : i32, i32
  }
  func.func @transform_1(%arg0: i32) -> (i32, i32) {
    %c0_i32 = arith.constant 0 : i32
    %c0_i32_0 = arith.constant 0 : i32
    return %arg0, %c0_i32 : i32, i32
  }
  func.func @transform_2(%arg0: i32) -> (i32, i32) {
    %c0_i32 = arith.constant 0 : i32
    %c0_i32_0 = arith.constant 0 : i32
    return %arg0, %c0_i32 : i32, i32
  }
  func.func @transform_3(%arg0: i32) -> (i32, i32) {
    %c0_i32 = arith.constant 0 : i32
    %c0_i32_0 = arith.constant 0 : i32
    return %arg0, %c0_i32 : i32, i32
  }
  func.func @transform_4(%arg0: i32) -> (i32, i32) {
    %c0_i32 = arith.constant 0 : i32
    %c0_i32_0 = arith.constant 0 : i32
    return %arg0, %c0_i32 : i32, i32
  }
}

</mosaic_0001>

<bundles_post_ra>
// kernel: gaussian_kl_div_loss.1
= control target key start
LH: loop header
LB: loop body
LE: loop exit
PB: predicated region body
PF: predicated region fallthrough
CT: control target
= control target key end

     0   :  { %s409_s15 = smov 0   ;;  %s435_s0 = inlined_call_operand.vmem [shape: f32[16,128], index: 0, kind: input, shape index: {}]   ;;  %s436_s1 = inlined_call_operand.vmem [shape: f32[16,128], index: 1, kind: input, shape index: {}]   ;;  %s437_s2 = inlined_call_operand.vmem [shape: f32[16,128], index: 2, kind: input, shape index: {}]   ;;  %s438_s3 = inlined_call_operand.vmem [shape: f32[16,128], index: 3, kind: input, shape index: {}]   ;;  %s439_s4 = inlined_call_operand.vmem [shape: f32[16,128], index: 4, kind: output, shape index: {}]  }
   0x1 LB: > { %s352_s16 = sadd.s32 4294967295, %s382_s15   ;;  %p356_p0 = scmp.ge.s32.totalorder %s382_s15, 1  ;;  %s382_s15 = sphi %s409_s15, %s14_s15  }
   0x2   : > { %p188_p1 = scmp.lt.s32.totalorder %s382_s15, 3 }
   0x4   : > { %p189_p2 = pnand %p356_p0, %p188_p1 }
   0x5   : > { %p224_p3 = scmp.lt.s32.totalorder (!%p189_p2), %s352_s16, 1 }
   0x6   : > { %192 = sbr.rel (%p189_p2) target bundleno = 35 (0x23), region = 36 }
   0xb   : > { %s441_s16 = smov (!%p224_p3, %s352_s16), 1 }
   0xc   : > { %s357_s17 = sshll.u32 %s441_s16, 3 }
   0xd   : > { %s227_s20 = scalar_lea.vmem %s435_s0, %s357_s17  ;;  %s231_s23 = scalar_lea.vmem %s436_s1, %s357_s17 }
   0xe   : > { %s235_s26 = scalar_lea.vmem %s437_s2, %s357_s17  ;;  %s239_s29 = scalar_lea.vmem %s438_s3, %s357_s17  ;;  %v245_v0 = vld [vmem:[%s231_s23] sm:$0xff] }
   0xf   : > { %v247_v1 = vld [vmem:[%s239_s29] sm:$0xff]  ;;  %s243_s6 = scalar_lea.vmem %s439_s4, %s357_s17 }
  0x10   : > { %v251_v2 = vsub.f32 %v245_v0, %v247_v1  ;;  %v256_v3 = vsub.f32 0.0, %v247_v1  ;;  %v244_v4 = vld [vmem:[%s227_s20] sm:$0xff]  ;;  %v249_v8 = vadd.f32 -1.0, %v247_v1 }
  0x11   : > { %v246_v5 = vld [vmem:[%s235_s26] sm:$0xff] }
  0x12   : > { %v252_v6 = vmul.f32 1.442695, %v251_v2  ;;  %v257_v7 = vmul.f32 1.442695, %v256_v3  ;;  %v248_v9 = vsub.f32 %v244_v4, %v246_v5  ;;  %v250_v10 = vsub.f32 %v249_v8, %v245_v0 }
  0x14   : > { %372 = vpow2.f32 %v252_v6  ;;  %v255_v11 = vmul.f32 %v248_v9, %v248_v9 }
  0x15   : > { %374 = vpow2.f32 %v257_v7 }
  0x1a   : > { %v373_v12 = vpop.eup %372 }
  0x1b   : > { %v375_v13 = vpop.eup %374  ;;  %v254_v14 = vadd.f32 %v373_v12, %v250_v10 }
  0x1c   : > { %v259_v15 = vmul.f32 %v375_v13, %v255_v11 }
  0x1e   : > { %v260_v16 = vadd.f32 %v259_v15, %v254_v14 }
  0x20   : > { %v261_v17 = vmul.f32 0.5, %v260_v16 }
  0x22   : > { %262 = vst [vmem:[%s243_s6] sm:$0xff] %v261_v17 }
  0x23 PF: > { %s14_s15 = sadd.s32 1, %s382_s15  }
  0x24   : > { %p11_p4 = scmp.ge.s32.totalorder %s14_s15, 4  }
  0x26   :  { %13 = sbr.rel (!%p11_p4) target bundleno = 1 (0x1), region = 75 }

</bundles_post_ra>
